<compile_context>
chip_gen: v6e
topology: v6e:2x2x1
jax: 0.10.0
libtpu: 0.0.40
codegen_flags: <defaults>
</compile_context>

<pallas_src>
import jax
import jax.numpy as jnp
from jax.experimental import pallas as pl
from jax.experimental.pallas import tpu as pltpu

INPUT_SIZE = 11
H1, H2, OUT = 10, 5, 1


def _round_up(n, m):
    return ((n + m - 1) // m) * m


def _mlp_kernel(x_ref, w1_ref, b1_ref, w2_ref, b2_ref, w3_ref, b3_ref, o_ref):
    # Lane-dense layout: x tile is (INPUT_SIZE, tb); batch on lanes, features
    # on sublanes.  Upcast once (bf16 producers supported; v5e's VPU has no
    # bf16 ops, so all downstream math is f32).
    x = x_ref[...].astype(jnp.float32)                                # (11, tb)

    hp = jax.lax.Precision.HIGHEST   # exact f32 MXU passes; free (mem-bound)

    h1 = jnp.dot(w1_ref[...], x, preferred_element_type=jnp.float32,
                 precision=hp) + b1_ref[...]
    h1 = jnp.maximum(h1, 0.0)                                         # (10, tb)

    h2 = jnp.dot(w2_ref[...], h1, preferred_element_type=jnp.float32,
                 precision=hp) + b2_ref[...]
    h2 = jnp.maximum(h2, 0.0)                                         # (5, tb)

    logits = jnp.dot(w3_ref[...], h2, preferred_element_type=jnp.float32,
                     precision=hp) + b3_ref[...]                      # (1, tb)

    # Sigmoid -> EUP transcendental slot (overlaps with VPU/DMA work).
    o_ref[...] = jax.nn.sigmoid(logits).astype(o_ref.dtype)


def _default_batch_tile():
    # v7x: ~3.2 TB/s HBM shrinks per-step DMA time while the ~0.35 us per-step
    # overhead stays fixed -> use a larger tile there (working set ~40 MiB,
    # fits v7x's 64 MiB VMEM with the raised vmem_limit_bytes below).
    try:
        if "v7" in jax.devices()[0].device_kind.lower():
            return 131072
    except Exception:
        pass
    return 32768   # v5e / v6e: already well past the step-overhead knee


def nn_model_forward_fm(xt, params, *, tb=None):
    """Fast path.  xt: feature-major activations, shape (INPUT_SIZE, B),
    float32 or bfloat16.  Returns sigmoid outputs of shape (OUT, B), float32.

    Producers that can emit (or keep) activations feature-major should call
    this directly: it is a single HBM pass over x (~48 bytes/sample in f32)."""
    F, B = xt.shape
    assert F == INPUT_SIZE

    w1, b1 = params["w1"], params["b1"]   # (10, 11), (10, 1)
    w2, b2 = params["w2"], params["b2"]   # (5, 10),  (5, 1)
    w3, b3 = params["w3"], params["b3"]   # (1, 5),   (1, 1)

    # ---- batch tile selection --------------------------------------------
    if tb is None:
        tb = _default_batch_tile()
    tb = max(128, _round_up(min(tb, _round_up(B, 128)), 128))
    # Keep >= 2 grid steps for non-tiny batches so the "parallel" batch axis
    # can be sharded across both v7x TensorCores (negligible cost elsewhere).
    if B > 2 * 128 and pl.cdiv(B, tb) < 2:
        tb = _round_up(pl.cdiv(B, 2), 128)
    grid = (pl.cdiv(B, tb),)   # ragged last block: Pallas clips the writeback

    # ---- VMEM budget: x/out double-buffered + f32 intermediates ------------
    x_tile_bytes = 16 * 4 * tb            # 11 -> 16 sublanes, f32 upper bound
    out_tile_bytes = 8 * 4 * tb           # 1 -> 8 sublanes
    interm_bytes = (16 + 8 + 8) * 4 * tb  # h1, h2, logits (rough)
    vmem_need = 2 * x_tile_bytes + 2 * out_tile_bytes + interm_bytes + (2 << 20)
    vmem_limit = int(min(max(vmem_need, 32 << 20), 56 << 20))  # <= v7x 64 MiB

    # Weights/biases: full-array blocks with constant index_map -> fetched once
    # and VMEM-resident for the whole grid (no per-step re-DMA: block index is
    # unchanged between consecutive steps).
    const = lambda a: pl.BlockSpec(a.shape, lambda i: (0, 0))

    weight_bytes = 4 * (INPUT_SIZE * H1 + H1 + H1 * H2 + H2 + H2 * OUT + OUT)
    cost = pl.CostEstimate(
        flops=2 * B * (INPUT_SIZE * H1 + H1 * H2 + H2 * OUT),
        transcendentals=B,
        bytes_accessed=B * (INPUT_SIZE * xt.dtype.itemsize + OUT * 4)
        + weight_bytes,
    )

    return pl.pallas_call(
        _mlp_kernel,
        out_shape=jax.ShapeDtypeStruct((OUT, B), jnp.float32),
        grid=grid,
        in_specs=[
            pl.BlockSpec((INPUT_SIZE, tb), lambda i: (0, i)),  # lane-dense x
            const(w1), const(b1),
            const(w2), const(b2),
            const(w3), const(b3),
        ],
        out_specs=pl.BlockSpec((OUT, tb), lambda i: (0, i)),   # lane-dense out
        compiler_params=pltpu.CompilerParams(
            dimension_semantics=("parallel",),   # v7x megacore sharding
            vmem_limit_bytes=vmem_limit,
        ),
        cost_estimate=cost,
    )(xt, w1, b1, w2, b2, w3, b3)


def nn_model_forward(x, params, *, tb=None):
    """PyTorch-shaped entry point matching NNModel.forward:
    x (B, ...) flattening to (B, INPUT_SIZE) -> (B, 1) float32.

    NOTE: the transpose below is one extra HBM read+write pass over x (as much
    traffic as the kernel's whole input stream).  Producers that can emit
    feature-major (INPUT_SIZE, B) activations should call nn_model_forward_fm
    directly and skip this cost."""
    B = x.shape[0]
    x2d = x.reshape(B, -1)
    assert x2d.shape[1] == INPUT_SIZE
    out = nn_model_forward_fm(x2d.T, params, tb=tb)      # (1, B)
    return out.reshape(B, OUT)   # (1,B)->(B,1): identical memory order, free


def init_params(key):
    """Deterministic init matching PyTorch Linear: W is (out, in), b is (out, 1)."""
    k1, k2, k3, k4, k5, k6 = jax.random.split(key, 6)

    def uniform(k, shape, fan_in):
        bound = 1.0 / jnp.sqrt(fan_in)
        return jax.random.uniform(k, shape, jnp.float32, -bound, bound)

    return {
        "w1": uniform(k1, (H1, INPUT_SIZE), INPUT_SIZE),
        "b1": uniform(k2, (H1, 1), INPUT_SIZE),
        "w2": uniform(k3, (H2, H1), H1),
        "b2": uniform(k4, (H2, 1), H1),
        "w3": uniform(k5, (OUT, H2), H2),
        "b3": uniform(k6, (OUT, 1), H2),
    }


def reference_forward(x, params):
    """Pure-JAX reference (PyTorch forward semantics), exact f32 matmuls."""
    hp = jax.lax.Precision.HIGHEST
    B = x.shape[0]
    h = x.reshape(B, -1).astype(jnp.float32)
    h = jnp.maximum(jnp.dot(h, params["w1"].T, precision=hp) + params["b1"][:, 0], 0.0)
    h = jnp.maximum(jnp.dot(h, params["w2"].T, precision=hp) + params["b2"][:, 0], 0.0)
    h = jnp.dot(h, params["w3"].T, precision=hp) + params["b3"][:, 0]
    return jax.nn.sigmoid(h)


if __name__ == "__main__":
    key = jax.random.PRNGKey(0)
    kx, kp = jax.random.split(key)
    params = init_params(kp)

    # 1) Small batch, single grid step, ragged (B=8 < 128-lane tile).
    B = 8
    x = jax.random.normal(kx, (B, INPUT_SIZE), jnp.float32)
    out = jax.block_until_ready(nn_model_forward(x, params))
    ref = reference_forward(x, params)
    assert out.shape == (B, OUT)
    assert jnp.allclose(out, ref, atol=1e-5, rtol=1e-5)

    # 2) Larger batch exercising the default tile path: auto-splits into >= 2
    #    grid steps (v7x megacore) with a ragged tail block and no host-side pad.
    B2 = 700
    x2 = jax.random.normal(jax.random.PRNGKey(1), (B2, INPUT_SIZE), jnp.float32)
    out2 = jax.block_until_ready(nn_model_forward(x2, params))
    ref2 = reference_forward(x2, params)
    assert out2.shape == (B2, OUT)
    assert jnp.allclose(out2, ref2, atol=1e-5, rtol=1e-5)

    # 3) Feature-major fast path with bf16 activations (upcast in-kernel).
    #    The cast here is test-only: real producers should hand over bf16
    #    feature-major data directly (never cast in the wrapper for perf).
    xt_bf16 = x2.reshape(B2, -1).T.astype(jnp.bfloat16)          # (11, B2)
    out3 = jax.block_until_ready(nn_model_forward_fm(xt_bf16, params))
    ref3 = reference_forward(x2.astype(jnp.bfloat16).astype(jnp.float32), params)
    assert out3.shape == (OUT, B2)
    assert jnp.allclose(out3.reshape(-1), ref3.reshape(-1), atol=1e-5, rtol=1e-5)

    print("KERNEL_OK")
</pallas_src>

<mosaic_0001>
module attributes {stable_mosaic.version = 11 : i64} {
  func.func @_mlp_kernel(%arg0: i32, %arg1: memref<11x128xf32, #tpu.memory_space<vmem>>, %arg2: memref<10x11xf32, #tpu.memory_space<vmem>>, %arg3: memref<10x1xf32, #tpu.memory_space<vmem>>, %arg4: memref<5x10xf32, #tpu.memory_space<vmem>>, %arg5: memref<5x1xf32, #tpu.memory_space<vmem>>, %arg6: memref<1x5xf32, #tpu.memory_space<vmem>>, %arg7: memref<1x1xf32, #tpu.memory_space<vmem>>, %arg8: memref<1x128xf32, #tpu.memory_space<vmem>>) attributes {dimension_semantics = [#tpu.dimension_semantics<parallel>], iteration_bounds = array<i64: 1>, scalar_prefetch = 0 : i64, scratch_operands = 0 : i64, tpu.core_type = #tpu.core_type<tc>, window_params = [{transform_indices = @transform_0, window_bounds = array<i64: 11, 128>}, {pipeline_mode = #tpu.pipeline_mode<synchronous>, transform_indices = @transform_1, window_bounds = array<i64: 10, 11>}, {pipeline_mode = #tpu.pipeline_mode<synchronous>, transform_indices = @transform_2, window_bounds = array<i64: 10, 1>}, {pipeline_mode = #tpu.pipeline_mode<synchronous>, transform_indices = @transform_3, window_bounds = array<i64: 5, 10>}, {pipeline_mode = #tpu.pipeline_mode<synchronous>, transform_indices = @transform_4, window_bounds = array<i64: 5, 1>}, {pipeline_mode = #tpu.pipeline_mode<synchronous>, transform_indices = @transform_5, window_bounds = array<i64: 1, 5>}, {pipeline_mode = #tpu.pipeline_mode<synchronous>, transform_indices = @transform_6, window_bounds = array<i64: 1, 1>}, {transform_indices = @transform_7, window_bounds = array<i64: 1, 128>}]} {
    %c0 = arith.constant 0 : index
    %c0_0 = arith.constant 0 : index
    %0 = vector.load %arg1[%c0, %c0_0] : memref<11x128xf32, #tpu.memory_space<vmem>>, vector<11x128xf32>
    %c0_1 = arith.constant 0 : index
    %c0_2 = arith.constant 0 : index
    %1 = vector.load %arg2[%c0_1, %c0_2] : memref<10x11xf32, #tpu.memory_space<vmem>>, vector<10x11xf32>
    %cst = arith.constant dense<0.000000e+00> : vector<10x128xf32>
    %2 = tpu.matmul %1, %0, %cst {dimension_numbers = #tpu.dot_dimension_numbers<[1], [0], [0], [1], [0, 0, 1, 1], [], []>, precision = #tpu.contract_precision<fp32>} : vector<10x11xf32>, vector<11x128xf32>, vector<10x128xf32> -> vector<10x128xf32>
    %c0_3 = arith.constant 0 : index
    %c0_4 = arith.constant 0 : index
    %3 = vector.load %arg3[%c0_3, %c0_4] : memref<10x1xf32, #tpu.memory_space<vmem>>, vector<10x1xf32>
    %4 = vector.broadcast %3 : vector<10x1xf32> to vector<10x128xf32>
    %5 = arith.addf %2, %4 : vector<10x128xf32>
    %cst_5 = arith.constant 0.000000e+00 : f32
    %6 = vector.broadcast %cst_5 : f32 to vector<10x128xf32>
    %7 = arith.maximumf %5, %6 : vector<10x128xf32>
    %c0_6 = arith.constant 0 : index
    %c0_7 = arith.constant 0 : index
    %8 = vector.load %arg4[%c0_6, %c0_7] : memref<5x10xf32, #tpu.memory_space<vmem>>, vector<5x10xf32>
    %cst_8 = arith.constant dense<0.000000e+00> : vector<5x128xf32>
    %9 = tpu.matmul %8, %7, %cst_8 {dimension_numbers = #tpu.dot_dimension_numbers<[1], [0], [0], [1], [0, 0, 1, 1], [], []>, precision = #tpu.contract_precision<fp32>} : vector<5x10xf32>, vector<10x128xf32>, vector<5x128xf32> -> vector<5x128xf32>
    %c0_9 = arith.constant 0 : index
    %c0_10 = arith.constant 0 : index
    %10 = vector.load %arg5[%c0_9, %c0_10] : memref<5x1xf32, #tpu.memory_space<vmem>>, vector<5x1xf32>
    %11 = vector.broadcast %10 : vector<5x1xf32> to vector<5x128xf32>
    %12 = arith.addf %9, %11 : vector<5x128xf32>
    %cst_11 = arith.constant 0.000000e+00 : f32
    %13 = vector.broadcast %cst_11 : f32 to vector<5x128xf32>
    %14 = arith.maximumf %12, %13 : vector<5x128xf32>
    %c0_12 = arith.constant 0 : index
    %c0_13 = arith.constant 0 : index
    %15 = vector.load %arg6[%c0_12, %c0_13] : memref<1x5xf32, #tpu.memory_space<vmem>>, vector<1x5xf32>
    %cst_14 = arith.constant dense<0.000000e+00> : vector<1x128xf32>
    %16 = tpu.matmul %15, %14, %cst_14 {dimension_numbers = #tpu.dot_dimension_numbers<[1], [0], [0], [1], [0, 0, 1, 1], [], []>, precision = #tpu.contract_precision<fp32>} : vector<1x5xf32>, vector<5x128xf32>, vector<1x128xf32> -> vector<1x128xf32>
    %c0_15 = arith.constant 0 : index
    %c0_16 = arith.constant 0 : index
    %17 = vector.load %arg7[%c0_15, %c0_16] : memref<1x1xf32, #tpu.memory_space<vmem>>, vector<1x1xf32>
    %18 = vector.broadcast %17 : vector<1x1xf32> to vector<1x128xf32>
    %19 = arith.addf %16, %18 : vector<1x128xf32>
    %20 = arith.negf %19 : vector<1x128xf32>
    %21 = math.exp %20 : vector<1x128xf32>
    %cst_17 = arith.constant 1.000000e+00 : f32
    %22 = vector.broadcast %cst_17 : f32 to vector<1x128xf32>
    %23 = arith.addf %22, %21 : vector<1x128xf32>
    %24 = arith.divf %22, %23 : vector<1x128xf32>
    %c0_18 = arith.constant 0 : index
    %c0_19 = arith.constant 0 : index
    %25 = vector.load %arg8[%c0_18, %c0_19] : memref<1x128xf32, #tpu.memory_space<vmem>>, vector<1x128xf32>
    tpu.vector_store %arg8[%c0_18, %c0_19], %24 {strides = array<i32>} : memref<1x128xf32, #tpu.memory_space<vmem>>, vector<1x128xf32>,
    return
  }
  func.func @transform_0(%arg0: i32) -> (i32, i32) {
    %c0_i32 = arith.constant 0 : i32
    %c0_i32_0 = arith.constant 0 : i32
    return %c0_i32, %arg0 : i32, i32
  }
  func.func @transform_1(%arg0: i32) -> (i32, i32) {
    %c0_i32 = arith.constant 0 : i32
    %c0_i32_0 = arith.constant 0 : i32
    %c0_i32_1 = arith.constant 0 : i32
    return %c0_i32, %c0_i32_0 : i32, i32
  }
  func.func @transform_2(%arg0: i32) -> (i32, i32) {
    %c0_i32 = arith.constant 0 : i32
    %c0_i32_0 = arith.constant 0 : i32
    %c0_i32_1 = arith.constant 0 : i32
    return %c0_i32, %c0_i32_0 : i32, i32
  }
  func.func @transform_3(%arg0: i32) -> (i32, i32) {
    %c0_i32 = arith.constant 0 : i32
    %c0_i32_0 = arith.constant 0 : i32
    %c0_i32_1 = arith.constant 0 : i32
    return %c0_i32, %c0_i32_0 : i32, i32
  }
  func.func @transform_4(%arg0: i32) -> (i32, i32) {
    %c0_i32 = arith.constant 0 : i32
    %c0_i32_0 = arith.constant 0 : i32
    %c0_i32_1 = arith.constant 0 : i32
    return %c0_i32, %c0_i32_0 : i32, i32
  }
  func.func @transform_5(%arg0: i32) -> (i32, i32) {
    %c0_i32 = arith.constant 0 : i32
    %c0_i32_0 = arith.constant 0 : i32
    %c0_i32_1 = arith.constant 0 : i32
    return %c0_i32, %c0_i32_0 : i32, i32
  }
  func.func @transform_6(%arg0: i32) -> (i32, i32) {
    %c0_i32 = arith.constant 0 : i32
    %c0_i32_0 = arith.constant 0 : i32
    %c0_i32_1 = arith.constant 0 : i32
    return %c0_i32, %c0_i32_0 : i32, i32
  }
  func.func @transform_7(%arg0: i32) -> (i32, i32) {
    %c0_i32 = arith.constant 0 : i32
    %c0_i32_0 = arith.constant 0 : i32
    return %c0_i32, %arg0 : i32, i32
  }
}

</mosaic_0001>

<bundles_post_ra>
// kernel: tpu_custom_call.1
= control target key start
LH: loop header
LB: loop body
LE: loop exit
PB: predicated region body
PF: predicated region fallthrough
CT: control target
= control target key end

     0   :  { %s1856_s0 = inlined_call_operand.vmem [shape: f32[11,8], index: 0, kind: input, shape index: {}]   ;;  %s1857_s1 = inlined_call_operand.vmem [shape: f32[10,11], index: 1, kind: input, shape index: {}]   ;;  %s1858_s2 = inlined_call_operand.vmem [shape: f32[10,1], index: 2, kind: input, shape index: {}]   ;;  %s1859_s3 = inlined_call_operand.vmem [shape: f32[5,10], index: 3, kind: input, shape index: {}]   ;;  %s1860_s4 = inlined_call_operand.vmem [shape: f32[5,1], index: 4, kind: input, shape index: {}]   ;;  %s1861_s5 = inlined_call_operand.vmem [shape: f32[1,5], index: 5, kind: input, shape index: {}]   ;;  %s1862_s6 = inlined_call_operand.<no memory space> [shape: f32[1,1], index: 6, kind: input, shape index: {}]   ;;  %s1863_s7 = inlined_call_operand.hbm [shape: f32[1,8], index: 7, kind: output, shape index: {}]  }
   0x1   :  { %v12_v0 = vstv %s1862_s6 }
   0x2   :  { %13 = vst [vmem:[#allocation2] sm:$0x1] %v12_v0 }
   0x3   :  { %v30_v1 = vld [vmem:[%s1856_s0 + $0x8] sm:$0x7]  ;;  %vm52_vm0 = vcmask 1042432   ;;  %v29_v2 = vld [vmem:[%s1856_s0] sm:$0xff]  ;;  %vm45_vm1 = vcmask 89088   ;;  %v1722_v11 = vmov 0  }
   0x4   :  { %v31_v3 = vld [vmem:[%s1857_s1] sm:$0xff]  ;;  %v54_v4 = vsel %vm52_vm0, %v30_v1, 0  ;;  %v1778_v5 = vand.u32 4294901760, %v29_v2  ;;  %v32_v6 = vld [vmem:[%s1857_s1 + $0x8] sm:$0x3]  ;;  %1694 = vset.pattern.permute.xlu0 %v1722_v11  ;;  %1695 = vset.pattern.permute.xlu1 %v1722_v11 }
   0x5   :  { %v47_v7 = vsel %vm45_vm1, %v31_v3, 0  ;;  %v85_v8 = vand.u32 4294901760, %v54_v4  ;;  %v50_v9 = vsel %vm45_vm1, %v32_v6, 0  ;;  %v34_v12 = vld [vmem:[%s1858_s2 + $0x8] sm:$0x3] }
   0x6   :  { %v123_v10 = vand.u32 4294901760, %v47_v7  ;;  %v133_v13 = vand.u32 4294901760, %v50_v9  ;;  %v180_v14 = vsub.f32 %v29_v2, %v1778_v5  ;;  %42 = vperm.xlu0 %1694, %v34_v12  }
   0x7   :  { %14 = vsyncpa [#allocation4], 0  ;;  %1576 = vmatprep.subr.mxu0 %v85_v8  ;;  %v173_v16 = vsub.f32 %v54_v4, %v85_v8  ;;  %v33_v17 = vld [vmem:[%s1858_s2] sm:$0xff]  ;;  %v1723_v31 = vmov 0.0   ;;  %vm1724_vm2 = vmmov 0   ;;  %vm567_vm3 = vcmask 80896  }
   0x8   :  { %v124_v15 = vsub.f32 %v47_v7, %v123_v10  ;;  %1587 = vmatprep.mubr.f32.mxu1 %v123_v10  ;;  %1577 = vmatpush3.msra.mxu0 %v85_v8  ;;  %v134_v18 = vsub.f32 %v50_v9, %v133_v13  ;;  %v181_v19 = vand.u32 4294901760, %v180_v14  ;;  %v561_v32 = vld [vmem:[%s1860_s4] sm:$0x1f]  ;;  %vm571_vm4 = vcmask 1041408  }
   0x9   :  { %1578 = vmatprep.subr.mxu0 %v1778_v5  ;;  %v174_v21 = vand.u32 4294901760, %v173_v16  ;;  %564 = vperm.xlu1 %1695, %v561_v32   ;;  %v1036_v33 = vld [vmem:[#allocation2] sm:$0x1]  ;;  %vm1046_vm5 = vcmask 39936   ;;  %vm1050_vm6 = vcmask 1044480  }
   0xa   :  { %v125_v20 = vand.u32 4294901760, %v124_v15  ;;  %1579 = vmatpush3.msra.mxu0 %v1778_v5  ;;  %v135_v22 = vand.u32 4294901760, %v134_v18  ;;  %v182_v23 = vsub.f32 %v180_v14, %v181_v19  ;;  %37 = vperm.xlu0 %1694, %v33_v17   ;;  %v560_v35 = vld [vmem:[%s1859_s3] sm:$0x1f] }
   0xb   :  { %v175_v25 = vsub.f32 %v173_v16, %v174_v21  ;;  %1590 = vmatprep.subr.mxu0 %v173_v16  ;;  %v569_v40 = vsel %vm567_vm3, %v560_v35, 0 }
   0xc   :  { %v126_v24 = vsub.f32 %v124_v15, %v125_v20  ;;  %v136_v26 = vsub.f32 %v134_v18, %v135_v22  ;;  %v183_v29 = vand.u32 4294901760, %v182_v23  ;;  %v1808_v46 = vand.u32 4294901760, %v569_v40 }
   0xd   :  { %v176_v28 = vand.u32 4294901760, %v175_v25  ;;  %1039 = vperm.xlu1 %1695, %v1036_v33  }
   0xe   :  { %v127_v27 = vand.u32 4294901760, %v126_v24  ;;  %v137_v30 = vand.u32 4294901760, %v136_v26  ;;  %v643_v52 = vsub.f32 %v569_v40, %v1808_v46 }
   0xf   :  { %1583 = vmatprep.subr.mxu1 %v176_v28 }
  0x10   :  { %1580 = vmatprep.mubr.f32.mxu0 %v127_v27  ;;  %1584 = vmatpush3.msra.mxu1 %v176_v28  ;;  %v644_v59 = vand.u32 4294901760, %v643_v52 }
  0x11   :  { %1581 = vmatmul.mubr.f32.vlgmr.msra.gmra.mxu0 %v137_v30  ;;  %1585 = vmatprep.subr.mxu1 %v183_v29 }
  0x12   :  { %1591 = vmatpush3.msra.mxu0 %v173_v16  ;;  %1586 = vmatpush3.msra.mxu1 %v183_v29  ;;  %v645_v2 = vsub.f32 %v643_v52, %v644_v59  ;;  %v1035_v16 = vld [vmem:[%s1861_s5] sm:$0x1]  ;;  %s1725_s5 = smov [#allocation3]  }
  0x13   :  { %1592 = vmatprep.subr.mxu0 %v180_v14  ;;  %1588 = vmatmul.mubr.f32.vlgmr.msra.gmra.mxu1 %v133_v13  ;;  %s1513_s15 = sshll.u32 %s1725_s5, 4  ;;  %s1514_s15 = int_to_ptr.vmem [resolvable:$true] %s1513_s15 }
  0x14   :  { %1593 = vmatpush3.msra.mxu0 %v180_v14  ;;  %1594 = vmatprep.mubr.f32.mxu0 %v124_v15  ;;  %v646_v7 = vand.u32 4294901760, %v645_v2  ;;  %s1700_s16 = scalar_lea.vmem %s1514_s15, 16  ;;  %s1704_s17 = scalar_lea.vmem %s1514_s15, 32 }
  0x15   :  { %1597 = vmatprep.subr.mxu1 %v85_v8  ;;  %1595 = vmatmul.mubr.f32.vlgmr.msra.gmra.mxu0 %v134_v18  ;;  %p1701_p0 = scmp.ne.s32.totalorder %s1514_s15, %s1700_s16  ;;  %p1705_p1 = scmp.lt.s32.totalorder %s1514_s15, %s1514_s15 }
  0x16   :  { %1598 = vmatpush3.msra.mxu1 %v85_v8  ;;  %1604 = vmatprep.subr.mxu0 %v174_v21  ;;  %p1706_p2 = scmp.lt.s32.totalorder %s1704_s17, %s1700_s16 }
  0x17   :  { %1599 = vmatprep.subr.mxu1 %v1778_v5  ;;  %1605 = vmatpush3.msra.mxu0 %v174_v21 }
  0x18   :  { %1600 = vmatpush3.msra.mxu1 %v1778_v5  ;;  %1601 = vmatprep.mubr.f32.mxu1 %v125_v20  ;;  %p1707_p3 = por %p1706_p2, %p1705_p1 }
  0x19   :  { %1606 = vmatprep.subr.mxu0 %v181_v19  ;;  %1602 = vmatmul.mubr.f32.vlgmr.msra.gmra.mxu1 %v135_v22 }
  0x1a   :  { %1607 = vmatpush3.msra.mxu0 %v181_v19  ;;  %1608 = vmatprep.mubr.f32.mxu0 %v123_v10  ;;  %v1048_v19 = vsel %vm1046_vm5, %v1035_v16, 0  ;;  %p1708_p4 = pnand %p1707_p3, %p1701_p0 }
  0x1b   :  { %1611 = vmatprep.subr.mxu1 %v85_v8  ;;  %1609 = vmatmul.mubr.f32.vlgmr.msra.gmra.mxu0 %v133_v13  ;;  %v1120_v23 = vand.u32 4294901760, %v1048_v19 }
  0x1c   :  { %1612 = vmatpush3.msra.mxu1 %v85_v8  ;;  %1615 = vmatprep.mubr.f32.mxu1 %v123_v10 }
  0x1d   :  { %1613 = vmatprep.subr.mxu1 %v1778_v5  ;;  %1618 = vmatprep.subr.mxu0 %v1723_v31  ;;  %v1121_v27 = vsub.f32 %v1048_v19, %v1120_v23 }
  0x1e   :  { %1614 = vmatpush3.msra.mxu1 %v1778_v5  ;;  %1622 = vmatprep.mubr.msk.f32.mxu0 %vm1724_vm2, %v1723_v31 }
  0x1f   :  { %1616 = vmatmul.mubr.f32.vlgmr.msra.gmra.mxu1 %v133_v13  ;;  %1625 = vmatprep.subr.mxu1 %v1723_v31  ;;  %v1122_v35 = vand.u32 4294901760, %v1121_v27 }
  0x20   :  { %1629 = vmatprep.mubr.msk.f32.mxu1 %vm1724_vm2, %v1723_v31 }
  0x21   :  { %v1123_v40 = vsub.f32 %v1121_v27, %v1122_v35 }
  0x81   :  { %v43_v34 = vpop.permute.xlu0 %42 }
  0x84   :  { %v565_v20 = vpop.permute.xlu1 %564 }
  0x85   :  { %v38_v38 = vpop.permute.xlu0 %37 }
  0xd1   :  { %v1582_v36 = vpop.f32.mrf.mxu0 }
  0xd2   :  { %v140_v37 = vadd.f32 %v1582_v36, %v43_v34 }
  0xd3   :  { %v129_v39 = vpop.f32.mrf.mxu0  ;;  %v1589_v42 = vpop.f32.mrf.mxu1 }
  0xd4   :  { %v130_v41 = vadd.f32 %v129_v39, %v38_v38  ;;  %v227_v43 = vadd.f32 %v1589_v42, %v140_v37 }
  0xd5   :  { %v1596_v44 = vpop.f32.mrf.mxu0  ;;  %v220_v45 = vpop.f32.mrf.mxu1 }
  0xd6   :  { %v310_v47 = vadd.f32 %v1596_v44, %v227_v43  ;;  %v221_v48 = vadd.f32 %v220_v45, %v130_v41  ;;  %v1124_v44 = vand.u32 4294901760, %v1123_v40 }
  0xd7   :  { %v302_v49 = vpop.f32.mrf.mxu0 }
  0xd8   :  { %v303_v50 = vadd.f32 %v302_v49, %v221_v48 }
  0xd9   :  { %v1603_v51 = vpop.f32.mrf.mxu1 }
  0xda   :  { %v393_v53 = vadd.f32 %v1603_v51, %v310_v47 }
  0xdb   :  { %v1610_v54 = vpop.f32.mrf.mxu0  ;;  %v384_v55 = vpop.f32.mrf.mxu1 }
  0xdc   :  { %v476_v56 = vadd.f32 %v1610_v54, %v393_v53  ;;  %v385_v57 = vadd.f32 %v384_v55, %v303_v50  ;;  %v1042_v50 = vlaneseq  ;;  %v1040_v54 = vpop.permute.xlu1 %1039 }
  0xdd   :  { %v469_v58 = vpop.f32.mrf.mxu0 }
  0xde   :  { %v470_v60 = vadd.f32 %v469_v58, %v385_v57  ;;  %v1043_v51 = vshrl.u32 %v1042_v50, 7 }
  0xdf   :  { %v1617_v61 = vpop.f32.mrf.mxu1 }
  0xe0   :  { %v555_v62 = vadd.f32 %v1617_v61, %v476_v56  ;;  %v1044_v53 = vsub.s32 0, %v1043_v51 }
  0xe1   :  { %v548_v63 = vpop.f32.mrf.mxu1 }
  0xe2   :  { %v559_v0 = vmax.f32 %v555_v62, 0.0  ;;  %v549_v1 = vadd.f32 %v548_v63, %v470_v60  ;;  %v1045_v57 = vrot.slane %v1040_v54, %v1044_v53 }
  0xe4   :  { %v573_v3 = vsel %vm571_vm4, %v559_v0, 0  ;;  %v558_v4 = vmax.f32 %v549_v1, 0.0 }
  0xe5   :  { %v604_v5 = vand.u32 4294901760, %v573_v3 }
  0xe6   :  { %v607_v6 = vand.u32 4294901760, %v558_v4 }
  0xe7   :  { %v682_v8 = vsub.f32 %v573_v3, %v604_v5  ;;  %1619 = vmatpush3.msra.mxu0 %v604_v5 }
  0xe8   :  { %v689_v9 = vsub.f32 %v558_v4, %v607_v6  ;;  %1620 = vmatprep.subr.mxu0 %v1723_v31 }
  0xe9   :  { %v683_v10 = vand.u32 4294901760, %v682_v8  ;;  %1621 = vmatpush3.msra.mxu0 %v607_v6 }
  0xea   :  { %v690_v11 = vand.u32 4294901760, %v689_v9  ;;  %1632 = vmatprep.subr.mxu0 %v1723_v31  ;;  %1623 = vmatmul.mubr.f32.vlgmr.msra.gmra.mxu0 %v646_v7 }
  0xeb   :  { %1633 = vmatpush3.msra.mxu0 %v682_v8  ;;  %1636 = vmatprep.mubr.msk.f32.mxu0 %vm1724_vm2, %v1723_v31  ;;  %v684_v12 = vsub.f32 %v682_v8, %v683_v10 }
  0xec   :  { %v691_v13 = vsub.f32 %v689_v9, %v690_v11  ;;  %1634 = vmatprep.subr.mxu0 %v1723_v31 }
  0xed   :  { %1635 = vmatpush3.msra.mxu0 %v689_v9  ;;  %v685_v14 = vand.u32 4294901760, %v684_v12 }
  0xee   :  { %1646 = vmatprep.subr.mxu0 %v1723_v31  ;;  %1637 = vmatmul.mubr.f32.vlgmr.msra.gmra.mxu0 %v643_v52  ;;  %v692_v15 = vand.u32 4294901760, %v691_v13 }
  0xef   :  { %1626 = vmatpush3.msra.mxu1 %v685_v14  ;;  %1647 = vmatpush3.msra.mxu0 %v683_v10 }
  0xf0   :  { %1627 = vmatprep.subr.mxu1 %v1723_v31  ;;  %1648 = vmatprep.subr.mxu0 %v1723_v31 }
  0xf1   :  { %1628 = vmatpush3.msra.mxu1 %v692_v15  ;;  %1649 = vmatpush3.msra.mxu0 %v690_v11 }
  0xf2   :  { %1630 = vmatmul.mubr.f32.vlgmr.msra.gmra.mxu1 %v1808_v46  ;;  %1639 = vmatprep.subr.mxu1 %v1723_v31 }
  0xf3   :  { %1640 = vmatpush3.msra.mxu1 %v604_v5  ;;  %1643 = vmatprep.mubr.msk.f32.mxu1 %vm1724_vm2, %v1723_v31 }
  0xf4   :  { %1641 = vmatprep.subr.mxu1 %v1723_v31  ;;  %1650 = vmatprep.mubr.msk.f32.mxu0 %vm1724_vm2, %v1723_v31 }
  0xf5   :  { %1642 = vmatpush3.msra.mxu1 %v607_v6  ;;  %1651 = vmatmul.mubr.f32.vlgmr.msra.gmra.mxu0 %v1808_v46 }
  0xf6   :  { %1644 = vmatmul.mubr.f32.vlgmr.msra.gmra.mxu1 %v644_v59  ;;  %1653 = vmatprep.subr.mxu1 %v1723_v31 }
  0xf7   :  { %1654 = vmatpush3.msra.mxu1 %v604_v5  ;;  %1657 = vmatprep.mubr.msk.f32.mxu1 %vm1724_vm2, %v1723_v31 }
  0xf8   :  { %1655 = vmatprep.subr.mxu1 %v1723_v31  ;;  %1660 = vmatprep.subr.mxu0 %v1723_v31 }
  0xf9   :  { %1656 = vmatpush3.msra.mxu1 %v607_v6  ;;  %1662 = vmatprep.mubr.msk.f32.mxu0 %vm1724_vm2, %v1723_v31 }
  0xfa   :  { %1658 = vmatmul.mubr.f32.vlgmr.msra.gmra.mxu1 %v1808_v46  ;;  %1665 = vmatprep.subr.mxu1 %v1723_v31 }
  0xfb   :  { %1667 = vmatprep.mubr.msk.f32.mxu1 %vm1724_vm2, %v1723_v31 }
 0x1aa   :  { %v648_v17 = vpop.f32.mrf.mxu0 }
 0x1ab   :  { %v649_v22 = vadd.f32 %v648_v17, %v565_v20 }
 0x1ac   :  { %v1624_v18 = vpop.f32.mrf.mxu0 }
 0x1ae   :  { %v805_v21 = vpop.f32.mrf.mxu0 }
 0x1b0   :  { %v1638_v24 = vpop.f32.mrf.mxu0 }
 0x1b2   :  { %v729_v25 = vpop.f32.mrf.mxu1 }
 0x1b3   :  { %v730_v26 = vadd.f32 %v729_v25, %v649_v22 }
 0x1b4   :  { %v1631_v28 = vpop.f32.mrf.mxu1 }
 0x1b5   :  { %v806_v29 = vadd.f32 %v805_v21, %v730_v26  ;;  %v957_v30 = vpop.f32.mrf.mxu0 }
 0x1b6   :  { %v880_v32 = vpop.f32.mrf.mxu1 }
 0x1b7   :  { %v881_v33 = vadd.f32 %v880_v32, %v806_v29  ;;  %v1652_v34 = vpop.f32.mrf.mxu0 }
 0x1b8   :  { %v1645_v36 = vpop.f32.mrf.mxu1 }
 0x1b9   :  { %v958_v37 = vadd.f32 %v957_v30, %v881_v33 }
 0x1ba   :  { %v1030_v38 = vpop.f32.mrf.mxu1 }
 0x1bb   :  { %v1031_v39 = vadd.f32 %v1030_v38, %v958_v37 }
 0x1bc   :  { %v1659_v41 = vpop.f32.mrf.mxu1 }
 0x1bd   :  { %v1034_v42 = vmax.f32 %v1031_v39, 0.0 }
 0x1bf   :  { %v1052_v43 = vsel %vm1050_vm6, %v1034_v42, 0 }
 0x1c0   :  { %v1085_v45 = vand.u32 4294901760, %v1052_v43 }
 0x1c2   :  { %v1162_v46 = vsub.f32 %v1052_v43, %v1085_v45  ;;  %1661 = vmatpush3.msra.mxu0 %v1085_v45 }
 0x1c3   :  { %1663 = vmatmul.mubr.f32.vlgmr.msra.gmra.mxu0 %v1124_v44  ;;  %1670 = vmatprep.subr.mxu0 %v1723_v31 }
 0x1c4   :  { %1671 = vmatpush3.msra.mxu0 %v1162_v46  ;;  %1672 = vmatprep.mubr.msk.f32.mxu0 %vm1724_vm2, %v1723_v31  ;;  %v1163_v47 = vand.u32 4294901760, %v1162_v46 }
 0x1c5   :  { %1680 = vmatprep.subr.mxu0 %v1723_v31 }
 0x1c6   :  { %v1164_v48 = vsub.f32 %v1162_v46, %v1163_v47 }
 0x1c7   :  { %1673 = vmatmul.mubr.f32.vlgmr.msra.gmra.mxu0 %v1121_v27 }
 0x1c8   :  { %1681 = vmatpush3.msra.mxu0 %v1163_v47  ;;  %v1165_v49 = vand.u32 4294901760, %v1164_v48  ;;  %1682 = vmatprep.mubr.msk.f32.mxu0 %vm1724_vm2, %v1723_v31 }
 0x1ca   :  { %1666 = vmatpush3.msra.mxu1 %v1165_v49 }
 0x1cb   :  { %1668 = vmatmul.mubr.f32.vlgmr.msra.gmra.mxu1 %v1120_v23  ;;  %1675 = vmatprep.subr.mxu1 %v1723_v31 }
 0x1cc   :  { %1676 = vmatpush3.msra.mxu1 %v1085_v45  ;;  %1677 = vmatprep.mubr.msk.f32.mxu1 %vm1724_vm2, %v1723_v31 }
 0x1cd   :  { %1685 = vmatprep.subr.mxu1 %v1723_v31  ;;  %1683 = vmatmul.mubr.f32.vlgmr.msra.gmra.mxu0 %v1120_v23 }
 0x1cf   :  { %1678 = vmatmul.mubr.f32.vlgmr.msra.gmra.mxu1 %v1122_v35 }
 0x1d0   :  { %1686 = vmatpush3.msra.mxu1 %v1085_v45  ;;  %1687 = vmatprep.mubr.msk.f32.mxu1 %vm1724_vm2, %v1723_v31 }
 0x1d3   :  { %1688 = vmatmul.mubr.f32.vlgmr.msra.gmra.mxu1 %v1120_v23 }
 0x283   :  { %v1126_v52 = vpop.f32.mrf.mxu0 }
 0x284   :  { %v1127_v59 = vadd.f32 %v1126_v52, %v1045_v57 }
 0x285   :  { %v1664_v55 = vpop.f32.mrf.mxu0 }
 0x287   :  { %v1276_v56 = vpop.f32.mrf.mxu0 }
 0x289   :  { %v1674_v58 = vpop.f32.mrf.mxu0 }
 0x28b   :  { %v1202_v60 = vpop.f32.mrf.mxu1 }
 0x28c   :  { %v1203_v61 = vadd.f32 %v1202_v60, %v1127_v59 }
 0x28d   :  { %v1669_v62 = vpop.f32.mrf.mxu1  ;;  %v1424_v63 = vpop.f32.mrf.mxu0 }
 0x28e   :  { %v1277_v0 = vadd.f32 %v1276_v56, %v1203_v61 }
 0x28f   :  { %v1350_v1 = vpop.f32.mrf.mxu1  ;;  %v1684_v2 = vpop.f32.mrf.mxu0 }
 0x290   :  { %v1351_v3 = vadd.f32 %v1350_v1, %v1277_v0 }
 0x291   :  { %v1679_v31 = vpop.f32.mrf.mxu1 }
 0x292   :  { %v1425_v4 = vadd.f32 %v1424_v63, %v1351_v3 }
 0x293   :  { %v1496_v5 = vpop.f32.mrf.mxu1 }
 0x294   :  { %v1497_v6 = vadd.f32 %v1496_v5, %v1425_v4 }
 0x295   :  { %v1689_v7 = vpop.f32.mrf.mxu1 }
 0x296   :  { %v1521_v8 = vmul.f32 -1.442695, %v1497_v6 }
 0x298   :  { %1696 = vpow2.f32 %v1521_v8 }
 0x2a5   :  { %v1697_v9 = vpop.eup %1696 }
 0x2a6   :  { %v1503_v10 = vadd.f32 1.0, %v1697_v9 }
 0x2a8   :  { %1698 = vrcp.f32 %v1503_v10 }
 0x2b5   :  { %v1699_v11 = vpop.eup %1698 }
 0x2b6   :  { %1506 = vst [vmem:[#allocation3] sm:$0x1] %v1699_v11 }
 0x2b7   :  { %1711 = shalt.err (!%p1708_p4)
}
 0x2b8   :  { %1516 = dma.vmem_to_hbm [thread:$0]  %s1514_s15, 16, %s1863_s7, [#allocation4]  }
 0x2b9   :  { %1720 = dma.done.wait [#allocation4], 16  }
 0x2ba   :  { %1721 = vsyncadd [#allocation4], 4294967280 }
 0x2bb   :  { %1520 = vsyncpa [#allocation4], 1 }

</bundles_post_ra>
